<compile_context>
chip_gen: v7x
topology: tpu7x:2x2x1
jax: 0.10.0
libtpu: 0.0.40
codegen_flags: <defaults>
</compile_context>

<pallas_src>
import jax
import jax.numpy as jnp
from jax.experimental import pallas as pl
from jax.experimental.pallas import tpu as pltpu


def _copy_kernel(x_ref, o_ref):
    # Hot path of BaseLayer.forward with an empty layer list: x -> x.
    o_ref[...] = x_ref[...]


def _choose_cols(total_elems, last_dim):
    """Pick a lane-dense (multiple-of-128) trailing width that divides the tensor."""
    if total_elems % 128 != 0:
        # Fallback: keep the original trailing dim (block will equal full dims).
        return last_dim
    cols = 128
    while cols * 2 <= 1024 and total_elems % (cols * 2) == 0:
        cols *= 2
    return cols


@jax.jit
def base_layer_forward(x):
    """Pallas implementation of BaseLayer.forward (identity, since layers == [])."""
    orig_shape = x.shape
    total = 1
    for d in orig_shape:
        total *= d

    cols = _choose_cols(total, orig_shape[-1])
    rows = total // cols
    x2d = x.reshape(rows, cols)

    # Row-tile so each block is ~2 MiB: with double-buffered input AND output
    # blocks the working set is ~4x tile_bytes = 8 MiB, which fits the scoped
    # VMEM default on every chip generation.  When the block does not cover
    # the full row extent, keep it a multiple of the 8-sublane granule.
    itemsize = jnp.dtype(x.dtype).itemsize
    target_tile_bytes = 2 * 1024 * 1024
    tile_r = max(1, target_tile_bytes // (cols * itemsize))
    if tile_r >= rows:
        tile_r = rows          # block equals full array dim -> always legal
    else:
        tile_r = max(8, (tile_r // 8) * 8)

    grid = (pl.cdiv(rows, tile_r),)

    out = pl.pallas_call(
        _copy_kernel,
        out_shape=jax.ShapeDtypeStruct((rows, cols), x.dtype),
        grid=grid,
        in_specs=[pl.BlockSpec((tile_r, cols), lambda i: (i, 0),
                               memory_space=pltpu.MemorySpace.VMEM)],
        out_specs=pl.BlockSpec((tile_r, cols), lambda i: (i, 0),
                               memory_space=pltpu.MemorySpace.VMEM),
        input_output_aliases={0: 0},
        compiler_params=pltpu.CompilerParams(
            dimension_semantics=("parallel",)),
    )(x2d)
    return out.reshape(orig_shape)


if __name__ == "__main__":
    key = jax.random.PRNGKey(0)
    # NCHW input consistent with a conv-style module: batch=2, channels=4, 16x16.
    x = jax.random.normal(key, (2, 4, 16, 16), dtype=jnp.float32)

    y = base_layer_forward(x)
    jax.block_until_ready(y)

    # Forward of BaseLayer with no layers must be exactly the input.
    assert y.shape == x.shape
    assert y.dtype == x.dtype
    assert bool(jnp.allclose(y, x))

    # TODO(synk): if concrete sub-layers were appended to self.layers, each
    # would need its own Pallas kernel chained here; the base class alone is identity.
    print("KERNEL_OK")
</pallas_src>

<mosaic_0001>
module attributes {stable_mosaic.version = 11 : i64} {
  func.func @_copy_kernel(%arg0: i32, %arg1: memref<2x1024xf32, #tpu.memory_space<vmem>>, %arg2: memref<2x1024xf32, #tpu.memory_space<vmem>>) attributes {dimension_semantics = [#tpu.dimension_semantics<parallel>], iteration_bounds = array<i64: 1>, scalar_prefetch = 0 : i64, scratch_operands = 0 : i64, tpu.core_type = #tpu.core_type<tc>, window_params = [{transform_indices = @transform_0, window_bounds = array<i64: 2, 1024>}, {transform_indices = @transform_1, window_bounds = array<i64: 2, 1024>}]} {
    %c0 = arith.constant 0 : index
    %c0_0 = arith.constant 0 : index
    %0 = vector.load %arg1[%c0, %c0_0] : memref<2x1024xf32, #tpu.memory_space<vmem>>, vector<2x1024xf32>
    %c0_1 = arith.constant 0 : index
    %c0_2 = arith.constant 0 : index
    %1 = vector.load %arg2[%c0_1, %c0_2] : memref<2x1024xf32, #tpu.memory_space<vmem>>, vector<2x1024xf32>
    tpu.vector_store %arg2[%c0_1, %c0_2], %0 {strides = array<i32>} : memref<2x1024xf32, #tpu.memory_space<vmem>>, vector<2x1024xf32>,
    return
  }
  func.func @transform_0(%arg0: i32) -> (i32, i32) {
    %c0_i32 = arith.constant 0 : i32
    %c0_i32_0 = arith.constant 0 : i32
    return %arg0, %c0_i32 : i32, i32
  }
  func.func @transform_1(%arg0: i32) -> (i32, i32) {
    %c0_i32 = arith.constant 0 : i32
    %c0_i32_0 = arith.constant 0 : i32
    return %arg0, %c0_i32 : i32, i32
  }
}

</mosaic_0001>

<bundles_post_ra>
// kernel: base_layer_forward.1
= control target key start
LH: loop header
LB: loop body
LE: loop exit
PB: predicated region body
PF: predicated region fallthrough
CT: control target
= control target key end

     0   :  { %s38_s0 = inlined_call_operand.vmem [shape: f32[2,1024], index: 0, kind: input, shape index: {}, may-alias: {0,1}]   ;;  %s39_s1 = inlined_call_operand.vmem [shape: f32[2,1024], index: 1, kind: output, shape index: {}, may-alias: {0,1}]  }
   0x1   :  { %v8_v0 = vld [vmem:[%s38_s0] sm:$0xff]  ;;  %v9_v1 = vld [vmem:[%s38_s0 + $0x8] sm:$0xff] }
   0x2   :  { %10 = vst [vmem:[%s39_s1] sm:$0xff] %v8_v0  ;;  %11 = vst [vmem:[%s39_s1 + $0x8] sm:$0xff] %v9_v1 }

</bundles_post_ra>
